<compile_context>
chip_gen: v7x
topology: tpu7x:2x2x1
jax: 0.10.0
libtpu: 0.0.40
codegen_flags: <defaults>
</compile_context>

<pallas_src>
import functools

import jax
import jax.numpy as jnp
from jax.experimental import pallas as pl
from jax.experimental.pallas import tpu as pltpu

N_LAYERS = 3
EPS = 1e-12       # F.normalize default eps
LANE = 128        # vreg lane width / MXU-friendly padding


def _round_up(x, m):
    return (x + m - 1) // m * m


# --------------------------- fused small-graph kernel ---------------------------
def _lightgcn_fused_kernel(adj_ref, emb_ref, out_ref, *, n_layers):
    """One graph per grid step, whole graph resident in VMEM.

    adj_ref: (1, Npad, Npad) bf16   emb_ref: (1, Npad, Dpad) f32
    out_ref: (1, Npad, Dpad) f32
    """
    adj = adj_ref[0]                          # (Npad, Npad) bf16
    e = emb_ref[0]                            # (Npad, Dpad) f32
    acc = e                                   # layer 0
    for _ in range(n_layers):                 # static unroll (n_layers small)
        e = jnp.dot(adj, e.astype(jnp.bfloat16),
                    preferred_element_type=jnp.float32)   # MXU, f32 accumulate
        acc = acc + e
    # F.normalize(p=2, dim=1) is scale-invariant -> skip the /(n_layers+1).
    sq = jnp.sum(acc * acc, axis=1, keepdims=True)
    inv = jax.lax.rsqrt(jnp.maximum(sq, EPS * EPS))        # EUP, ~free
    out_ref[0] = (acc * inv).astype(out_ref.dtype)


def _lightgcn_forward_fused(adj_mashup, adj_api, mashup_emb, api_emb,
                            n_layers, npad, dpad):
    n_m, d = mashup_emb.shape
    n_a, _ = api_emb.shape

    def pad2(x, r, c, dtype):
        return jnp.zeros((r, c), dtype).at[:x.shape[0], :x.shape[1]].set(x.astype(dtype))

    # bf16 adjacency halves DMA bytes and matches native MXU dtype.
    adj_b = jnp.stack([pad2(adj_mashup, npad, npad, jnp.bfloat16),
                       pad2(adj_api, npad, npad, jnp.bfloat16)])
    emb_b = jnp.stack([pad2(mashup_emb, npad, dpad, jnp.float32),
                       pad2(api_emb, npad, dpad, jnp.float32)])

    kernel = functools.partial(_lightgcn_fused_kernel, n_layers=n_layers)
    out = pl.pallas_call(
        kernel,
        out_shape=jax.ShapeDtypeStruct((2, npad, dpad), jnp.float32),
        grid=(2,),                                       # graph axis (mashup, api)
        in_specs=[
            pl.BlockSpec((1, npad, npad), lambda g: (g, 0, 0)),
            pl.BlockSpec((1, npad, dpad), lambda g: (g, 0, 0)),
        ],
        out_specs=pl.BlockSpec((1, npad, dpad), lambda g: (g, 0, 0)),
        compiler_params=pltpu.CompilerParams(
            dimension_semantics=("parallel",)),          # 2 TCs on v7x
    )(adj_b, emb_b)
    return out[0, :n_m, :d], out[1, :n_a, :d]


# ------------------------- tiled variant (large graphs) -------------------------
def _spmm_tiled_kernel(adj_ref, x_ref, out_ref, acc_ref):
    """out = adj @ x, tiled over (row_tile, k_tile), f32 accumulator in VMEM."""
    @pl.when(pl.program_id(1) == 0)
    def _():
        acc_ref[...] = jnp.zeros_like(acc_ref)
    acc_ref[...] += jnp.dot(adj_ref[...], x_ref[...],
                            preferred_element_type=jnp.float32)
    @pl.when(pl.program_id(1) == pl.num_programs(1) - 1)
    def _():
        out_ref[...] = acc_ref[...].astype(out_ref.dtype)


def _spmm_tiled(adj_bf16, x_f32, *, tile):
    npad, dpad = x_f32.shape
    x_bf = x_f32.astype(jnp.bfloat16)
    return pl.pallas_call(
        _spmm_tiled_kernel,
        out_shape=jax.ShapeDtypeStruct((npad, dpad), jnp.float32),
        grid=(npad // tile, npad // tile),
        in_specs=[
            pl.BlockSpec((tile, tile), lambda i, k: (i, k)),
            pl.BlockSpec((tile, dpad), lambda i, k: (k, 0)),
        ],
        out_specs=pl.BlockSpec((tile, dpad), lambda i, k: (i, 0)),
        scratch_shapes=[pltpu.VMEM((tile, dpad), jnp.float32)],
        compiler_params=pltpu.CompilerParams(
            dimension_semantics=("parallel", "arbitrary")),
    )(adj_bf16, x_bf)


def _normalize_kernel(x_ref, out_ref):
    x = x_ref[...]
    sq = jnp.sum(x * x, axis=1, keepdims=True)
    inv = jax.lax.rsqrt(jnp.maximum(sq, EPS * EPS))
    out_ref[...] = (x * inv).astype(out_ref.dtype)


def _row_normalize(x, *, tm):
    n, d = x.shape
    return pl.pallas_call(
        _normalize_kernel,
        out_shape=jax.ShapeDtypeStruct((n, d), x.dtype),
        grid=(n // tm,),
        in_specs=[pl.BlockSpec((tm, d), lambda i: (i, 0))],
        out_specs=pl.BlockSpec((tm, d), lambda i: (i, 0)),
        compiler_params=pltpu.CompilerParams(dimension_semantics=("parallel",)),
    )(x)


def _lightgcn_propagate_tiled(adj, emb, n_layers=N_LAYERS, *, tile=512):
    """HBM-streaming path for graphs whose adjacency does not fit VMEM."""
    n, d = emb.shape
    npad = _round_up(n, tile)
    dpad = _round_up(d, LANE)
    adj_p = jnp.zeros((npad, npad), jnp.bfloat16).at[:n, :n].set(adj.astype(jnp.bfloat16))
    e = jnp.zeros((npad, dpad), jnp.float32).at[:n, :d].set(emb.astype(jnp.float32))
    acc = e
    for _ in range(n_layers):
        e = _spmm_tiled(adj_p, e, tile=tile)
        acc = acc + e
    out = _row_normalize(acc, tm=tile)
    return out[:n, :d]


# ----------------------------------- forward -----------------------------------
def lightgcn_forward(adj_mashup, adj_api, mashup_emb, api_emb,
                     n_layers=N_LAYERS, max_resident_n=1024):
    """Mirror of LightGCN.forward -> (final_mashup, final_api)."""
    n_m, d = mashup_emb.shape
    n_a, d2 = api_emb.shape
    assert d == d2
    assert adj_mashup.shape == (n_m, n_m) and adj_api.shape == (n_a, n_a)
    npad = max(_round_up(n_m, LANE), _round_up(n_a, LANE))
    dpad = _round_up(d, LANE)
    if npad <= max_resident_n:
        # whole-graph resident, single fused launch (fits default scoped VMEM
        # even double-buffered; cap re-derived for v7x's 64 MiB VMEM as well).
        return _lightgcn_forward_fused(adj_mashup, adj_api, mashup_emb, api_emb,
                                       n_layers, npad, dpad)
    return (_lightgcn_propagate_tiled(adj_mashup, mashup_emb, n_layers),
            _lightgcn_propagate_tiled(adj_api, api_emb, n_layers))


# ----------------------------- reference (pure JAX) -----------------------------
def _reference_one(adj, emb, n_layers=N_LAYERS):
    layers = [emb]
    for _ in range(n_layers):
        layers.append(adj @ layers[-1])
    final = jnp.mean(jnp.stack(layers), axis=0)
    norm = jnp.maximum(jnp.linalg.norm(final, axis=1, keepdims=True), EPS)
    return final / norm


def _reference_forward(adj_mashup, adj_api, mashup_emb, api_emb, n_layers=N_LAYERS):
    return (_reference_one(adj_mashup, mashup_emb, n_layers),
            _reference_one(adj_api, api_emb, n_layers))


# ---------------------------------- demo inputs ----------------------------------
def _make_norm_adj(key, n):
    """Deterministic dense 'sparse-like' adjacency with symmetric degree norm."""
    mask = (jax.random.uniform(key, (n, n)) < 0.15).astype(jnp.float32)
    adj = jnp.maximum(mask, mask.T)                       # symmetric
    adj = adj * (1.0 - jnp.eye(n, dtype=jnp.float32))     # no self loops
    deg = jnp.clip(jnp.sum(adj, axis=1), 1.0, None)
    d_inv_sqrt = 1.0 / jnp.sqrt(deg)
    return adj * d_inv_sqrt[:, None] * d_inv_sqrt[None, :]


if __name__ == "__main__":
    emb_dim = 64          # module default
    n_mashup, n_api = 64, 48

    key = jax.random.PRNGKey(0)
    k1, k2, k3, k4, k5, k6 = jax.random.split(key, 6)

    adj_mashup = _make_norm_adj(k1, n_mashup)
    adj_api = _make_norm_adj(k2, n_api)
    mashup_emb = jax.random.normal(k3, (n_mashup, emb_dim), dtype=jnp.float32)
    api_emb = jax.random.normal(k4, (n_api, emb_dim), dtype=jnp.float32)

    # fused single-launch path
    final_mashup, final_api = lightgcn_forward(adj_mashup, adj_api, mashup_emb, api_emb)
    jax.block_until_ready((final_mashup, final_api))

    ref_mashup, ref_api = _reference_forward(adj_mashup, adj_api, mashup_emb, api_emb)
    assert final_mashup.shape == (n_mashup, emb_dim)
    assert final_api.shape == (n_api, emb_dim)
    # bf16 MXU inputs (f32 accumulation) -> relaxed tolerance vs. the f32 reference.
    assert jnp.allclose(final_mashup, ref_mashup, atol=2e-2, rtol=2e-2)
    assert jnp.allclose(final_api, ref_api, atol=2e-2, rtol=2e-2)

    # tiled HBM-streaming path, exercised on a graph spanning multiple tiles
    n_big = 200
    adj_big = _make_norm_adj(k5, n_big)
    emb_big = jax.random.normal(k6, (n_big, emb_dim), dtype=jnp.float32)
    out_big = _lightgcn_propagate_tiled(adj_big, emb_big, N_LAYERS, tile=128)
    jax.block_until_ready(out_big)
    ref_big = _reference_one(adj_big, emb_big, N_LAYERS)
    assert out_big.shape == (n_big, emb_dim)
    assert jnp.allclose(out_big, ref_big, atol=2e-2, rtol=2e-2)

    print("KERNEL_OK")
</pallas_src>

<mosaic_0001>
module attributes {stable_mosaic.version = 11 : i64} {
  func.func @_lightgcn_fused_kernel(%arg0: i32, %arg1: memref<1x128x128xbf16, #tpu.memory_space<vmem>>, %arg2: memref<1x128x128xf32, #tpu.memory_space<vmem>>, %arg3: memref<1x128x128xf32, #tpu.memory_space<vmem>>) attributes {dimension_semantics = [#tpu.dimension_semantics<parallel>], iteration_bounds = array<i64: 2>, scalar_prefetch = 0 : i64, scratch_operands = 0 : i64, tpu.core_type = #tpu.core_type<tc>, window_params = [{transform_indices = @transform_0, window_bounds = array<i64: 1, 128, 128>}, {transform_indices = @transform_1, window_bounds = array<i64: 1, 128, 128>}, {transform_indices = @transform_2, window_bounds = array<i64: 1, 128, 128>}]} {
    %c0 = arith.constant 0 : index
    %c0_0 = arith.constant 0 : index
    %c0_1 = arith.constant 0 : index
    %0 = vector.load %arg1[%c0, %c0_0, %c0_1] : memref<1x128x128xbf16, #tpu.memory_space<vmem>>, vector<1x128x128xbf16>
    %1 = vector.shape_cast %0 : vector<1x128x128xbf16> to vector<128x128xbf16>
    %c0_2 = arith.constant 0 : index
    %c0_3 = arith.constant 0 : index
    %c0_4 = arith.constant 0 : index
    %2 = vector.load %arg2[%c0_2, %c0_3, %c0_4] : memref<1x128x128xf32, #tpu.memory_space<vmem>>, vector<1x128x128xf32>
    %3 = vector.shape_cast %2 : vector<1x128x128xf32> to vector<128x128xf32>
    %4 = arith.truncf %3 : vector<128x128xf32> to vector<128x128xbf16>
    %cst = arith.constant dense<0.000000e+00> : vector<128x128xf32>
    %5 = tpu.matmul %1, %4, %cst {dimension_numbers = #tpu.dot_dimension_numbers<[1], [0], [0], [1], [0, 0, 1, 1], [], []>} : vector<128x128xbf16>, vector<128x128xbf16>, vector<128x128xf32> -> vector<128x128xf32>
    %6 = arith.addf %3, %5 : vector<128x128xf32>
    %7 = arith.truncf %5 : vector<128x128xf32> to vector<128x128xbf16>
    %cst_5 = arith.constant dense<0.000000e+00> : vector<128x128xf32>
    %8 = tpu.matmul %1, %7, %cst_5 {dimension_numbers = #tpu.dot_dimension_numbers<[1], [0], [0], [1], [0, 0, 1, 1], [], []>} : vector<128x128xbf16>, vector<128x128xbf16>, vector<128x128xf32> -> vector<128x128xf32>
    %9 = arith.addf %6, %8 : vector<128x128xf32>
    %10 = arith.truncf %8 : vector<128x128xf32> to vector<128x128xbf16>
    %cst_6 = arith.constant dense<0.000000e+00> : vector<128x128xf32>
    %11 = tpu.matmul %1, %10, %cst_6 {dimension_numbers = #tpu.dot_dimension_numbers<[1], [0], [0], [1], [0, 0, 1, 1], [], []>} : vector<128x128xbf16>, vector<128x128xbf16>, vector<128x128xf32> -> vector<128x128xf32>
    %12 = arith.addf %9, %11 : vector<128x128xf32>
    %13 = arith.mulf %12, %12 : vector<128x128xf32>
    %cst_7 = arith.constant dense<0.000000e+00> : vector<128xf32>
    %14 = vector.multi_reduction <add>, %13, %cst_7 [1] : vector<128x128xf32> to vector<128xf32>
    %15 = vector.shape_cast %14 : vector<128xf32> to vector<128x1xf32>
    %cst_8 = arith.constant 1.000000e-24 : f32
    %16 = vector.broadcast %cst_8 : f32 to vector<128x1xf32>
    %17 = arith.maximumf %15, %16 : vector<128x1xf32>
    %18 = math.rsqrt %17 : vector<128x1xf32>
    %19 = vector.broadcast %18 : vector<128x1xf32> to vector<128x128xf32>
    %20 = arith.mulf %12, %19 : vector<128x128xf32>
    %c0_9 = arith.constant 0 : index
    %c0_10 = arith.constant 0 : index
    %c0_11 = arith.constant 0 : index
    %21 = vector.load %arg3[%c0_9, %c0_10, %c0_11] : memref<1x128x128xf32, #tpu.memory_space<vmem>>, vector<1x128x128xf32>
    %22 = vector.shape_cast %21 : vector<1x128x128xf32> to vector<128x128xf32>
    %23 = vector.shape_cast %20 : vector<128x128xf32> to vector<1x128x128xf32>
    tpu.vector_store %arg3[%c0_9, %c0_10, %c0_11], %23 {strides = array<i32>} : memref<1x128x128xf32, #tpu.memory_space<vmem>>, vector<1x128x128xf32>,
    return
  }
  func.func @transform_0(%arg0: i32) -> (i32, i32, i32) {
    %c0_i32 = arith.constant 0 : i32
    %c0_i32_0 = arith.constant 0 : i32
    %c0_i32_1 = arith.constant 0 : i32
    return %arg0, %c0_i32, %c0_i32_0 : i32, i32, i32
  }
  func.func @transform_1(%arg0: i32) -> (i32, i32, i32) {
    %c0_i32 = arith.constant 0 : i32
    %c0_i32_0 = arith.constant 0 : i32
    %c0_i32_1 = arith.constant 0 : i32
    return %arg0, %c0_i32, %c0_i32_0 : i32, i32, i32
  }
  func.func @transform_2(%arg0: i32) -> (i32, i32, i32) {
    %c0_i32 = arith.constant 0 : i32
    %c0_i32_0 = arith.constant 0 : i32
    %c0_i32_1 = arith.constant 0 : i32
    return %arg0, %c0_i32, %c0_i32_0 : i32, i32, i32
  }
}

</mosaic_0001>

<bundles_post_ra>
// kernel: tpu_custom_call.1
= control target key start
LH: loop header
LB: loop body
LE: loop exit
PB: predicated region body
PF: predicated region fallthrough
CT: control target
= control target key end

     0   :  { %7 = vsyncpa [#allocation3], 0  ;;  %s1803_s0 = inlined_call_operand.hbm [shape: bf16[2,128,128], index: 0, kind: input, shape index: {}]   ;;  %s1804_s1 = inlined_call_operand.hbm [shape: f32[2,128,128], index: 1, kind: input, shape index: {}]   ;;  %s1805_s2 = inlined_call_operand.hbm [shape: f32[2,128,128], index: 2, kind: output, shape index: {}]  }
   0x1   :  { %9 = vsyncpa [#allocation3 + $0x1], 0 }
   0x2   :  { %10 = vsyncpa [#allocation6], 0 }
   0x3   :  { %12 = vsyncpa [#allocation6 + $0x1], 0 }
   0x4   :  { %13 = vsyncpa [#allocation4], 0 }
   0x5   :  { %15 = vsyncpa [#allocation4 + $0x1], 0  ;;  %s1310_s9 = smov 0   ;;  %s1312_s10 = smov 0  }
   0x6   :  { %s1314_s11 = smov 0   ;;  %s1316_s12 = smov 0  }
   0x7 LB: > { %s1331_s13 = sadd.s32 4294967295, %s1284_s12   ;;  %s868_s14 = sadd.s32 4294967294, %s1284_s12   ;;  %s1284_s12 = sphi %s1316_s12, %s1821_s12   ;;  %s1280_s11 = sphi %s1314_s11, %s1820_s11   ;;  %s1276_s10 = sphi %s1312_s10, %s1819_s10   ;;  %s1272_s9 = sphi %s1310_s9, %s1818_s9  }
   0x8   : > { %s1335_s15 = sadd.s32 1, %s1284_s12   ;;  %s28_s16 = sadd.s32 1, %s1280_s11 }
   0x9   : > { %s25_s17 = ssub.s32 %s1284_s12, %s1335_s15  ;;  %p35_p0 = scmp.ne.s32.totalorder %s1280_s11, %s1276_s10 }
   0xa   : > { %p26_p1 = scmp.eq.s32.totalorder %s25_s17, 0  ;;  %p36_p2 = scmp.eq.s32.totalorder %s1284_s12, 0 }
   0xb   : > { %p41_p3 = scmp.ne.s32.totalorder %s1276_s10, %s1272_s9  ;;  %p42_p4 = scmp.eq.s32.totalorder %s1331_s13, 0 }
   0xc   : > { %s1347_s18 = scalar_select %p26_p1, %s1280_s11, %s28_s16  }
   0xd   : > { %p1349_p5 = por %p36_p2, %p35_p0  ;;  %p1353_p6 = por %p42_p4, %p41_p3 }
   0xe   : > { %p91_p7 = scmp.eq.s32.totalorder %s1331_s13, 1  ;;  %p97_p8 = scmp.eq.s32.totalorder %s868_s14, 1 }
   0xf   : > { %s1809_s20 = scalar_select %p1353_p6, 1, 0 }
  0x10   : > { %p1074_p10 = scmp.lt.s32.totalorder %s1284_s12, 2  ;;  %p1360_p11 = por %p91_p7, %p35_p0 }
  0x11   : > { %p1364_p12 = por %p97_p8, %p41_p3  ;;  %s1369_s23 = sand.u32 1, %s1280_s11  }
  0x12   : > { %s1810_s21 = scalar_select %p1360_p11, 1, 0 }
  0x13   : > { %s1811_s22 = scalar_select %p1364_p12, 1, 0 }
  0x14   : > { %s894_s24 = sshll.u32 %s1284_s12, 10  ;;  %s871_s25 = sshll.u32 %s1369_s23, 6 }
  0x15   : > { %s1376_s28 = scalar_lea.hbm %s1803_s0, %s894_s24  ;;  %s121_s29 = scalar_lea.vmem [#allocation2], %s871_s25 }
  0x16   : > { %s128_s30 = sshll.u32 %s121_s29, 4  ;;  %p1380_p13 = pnand %p1074_p10, %p1349_p5  ;;  %s1384_s30 = int_to_ptr.vmem [resolvable:$true] %s128_s30 }
  0x17   : > { %s118_s4 = scalar_lea.sflag [#allocation3], %s1369_s23  ;;  %s1154_s5 = scalar_lea.hbm %s1376_s28, 1024 }
  0x18   : > { %p1155_p0 = scmp.ne.s32.totalorder %s1376_s28, %s1154_s5  ;;  %p1156_p1 = pneg %p1380_p13 }
  0x19   : > { %s1159_s8 = scalar_lea.hbm %s1803_s0, 2048  ;;  %p1160_p4 = scmp.lt.u32.totalorder %s1376_s28, %s1803_s0 }
  0x1a   : > { %p1157_p2 = pnand %p1156_p1, %p1155_p0  ;;  %p1161_p5 = scmp.lt.u32.totalorder %s1159_s8, %s1154_s5 }
  0x1b   : > { %p1163_p8 = scmp.lt.u32.totalorder %s1154_s5, %s1376_s28 }
  0x1c   : > { %p1158_p3 = pneg %p1157_p2  ;;  %p1162_p7 = por %p1161_p5, %p1160_p4 }
  0x1e   : > { %p1164_p10 = por %p1163_p8, %p1162_p7 }
  0x20   : > { %p1165_p9 = pnand %p1164_p10, %p1158_p3 }
  0x22   : > { %1168 = shalt.err (!%p1165_p9)
}
  0x23   : > { %s1169_s17 = scalar_lea.vmem %s1384_s30, 1024  ;;  %s1286_s19 = smov [#allocation2]  }
  0x24   : > { %p1170_p0 = scmp.ne.s32.totalorder %s1384_s30, %s1169_s17  ;;  %s1174_s24 = sshll.u32 %s1286_s19, 4  ;;  %s1175_s24 = int_to_ptr.vmem [resolvable:$false] %s1174_s24 }
  0x25   : > { %s1176_s25 = scalar_lea.vmem %s1175_s24, 2048  ;;  %p1177_p11 = scmp.lt.s32.totalorder %s1384_s30, %s1175_s24 }
  0x26   : > { %p1172_p2 = pnand %p1170_p0, %p1156_p1  ;;  %p1178_p4 = scmp.lt.s32.totalorder %s1176_s25, %s1169_s17 }
  0x28   : > { %p1173_p12 = pneg %p1172_p2  ;;  %p1179_p5 = por %p1178_p4, %p1177_p11 }
  0x2a   : > { %p1180_p7 = pnand %p1179_p5, %p1173_p12 }
  0x2c   : > { %1183 = shalt.err (!%p1180_p7)
}
  0x2d   : > { %s1287_s26 = smov 64   ;;  %s1288_s27 = smov 4  }
  0x2e   : > { %1066 = dma.hbm_to_vmem [thread:$0]  (!%p1380_p13), %s1376_s28, 1024, %s1384_s30, %s118_s4, %s1287_s26, %s1287_s26, %s1288_s27  }
  0x2f   : > { %p877_p9 = scmp.ge.s32.totalorder %s1284_s12, 1  ;;  %p157_p3 = scmp.lt.s32.totalorder %s1284_s12, 3 }
  0x30   : > { %s874_s29 = sshll.u32 %s1369_s23, 7  ;;  %s895_s6 = sshll.u32 %s1284_s12, 11 }
  0x31   : > { %p1417_p11 = pnand %p877_p9, %p157_p3  ;;  %s142_s7 = scalar_lea.vmem [#allocation5], %s874_s29 }
  0x32   : > { %s149_s8 = sshll.u32 %s142_s7, 4  ;;  %s1425_s17 = scalar_lea.hbm %s1804_s1, %s895_s6  ;;  %s1427_s8 = int_to_ptr.vmem [resolvable:$true] %s149_s8 }
  0x33   : > { %s139_s28 = scalar_lea.sflag [#allocation6], %s1369_s23  ;;  %s1184_s30 = scalar_lea.hbm %s1425_s17, 2048 }
  0x34   : > { %p1185_p12 = scmp.ne.s32.totalorder %s1425_s17, %s1184_s30  ;;  %s1189_s24 = scalar_lea.hbm %s1804_s1, 4096 }
  0x35   : > { %p1190_p0 = scmp.lt.u32.totalorder %s1425_s17, %s1804_s1  ;;  %p1191_p2 = scmp.lt.u32.totalorder %s1189_s24, %s1184_s30 }
  0x36   : > { %p1187_p8 = pnand %p1185_p12, %p1156_p1  ;;  %p1193_p5 = scmp.lt.u32.totalorder %s1184_s30, %s1425_s17 }
  0x37   : > { %p1192_p4 = por %p1191_p2, %p1190_p0 }
  0x38   : > { %p1188_p10 = pneg %p1187_p8 }
  0x39   : > { %p1194_p7 = por %p1193_p5, %p1192_p4 }
  0x3b   : > { %p1195_p9 = pnand %p1194_p7, %p1188_p10 }
  0x3d   : > { %1198 = shalt.err (!%p1195_p9)
}
  0x3e   : > { %s1199_s27 = scalar_lea.vmem %s1427_s8, 2048  ;;  %s1289_s29 = smov [#allocation5]  }
  0x3f   : > { %p1200_p3 = scmp.ne.s32.totalorder %s1427_s8, %s1199_s27  ;;  %s1204_s6 = sshll.u32 %s1289_s29, 4  ;;  %s1205_s6 = int_to_ptr.vmem [resolvable:$false] %s1204_s6 }
  0x40   : > { %s1206_s7 = scalar_lea.vmem %s1205_s6, 4096  ;;  %p1207_p6 = scmp.lt.s32.totalorder %s1427_s8, %s1205_s6 }
  0x41   : > { %p1202_p12 = pnand %p1200_p3, %p1156_p1  ;;  %p1208_p0 = scmp.lt.s32.totalorder %s1206_s7, %s1199_s27 }
  0x43   : > { %p1203_p8 = pneg %p1202_p12  ;;  %p1209_p2 = por %p1208_p0, %p1207_p6 }
  0x45   : > { %p1210_p4 = pnand %p1209_p2, %p1203_p8 }
  0x47   : > { %1213 = shalt.err (!%p1210_p4)
}
  0x48   : > { %s1290_s14 = smov 128   ;;  %s1291_s16 = smov 8  }
  0x49   : > { %1069 = dma.hbm_to_vmem [thread:$0]  (!%p1380_p13), %s1425_s17, 2048, %s1427_s8, %s139_s28, %s1290_s14, %s1290_s14, %s1291_s16  }
  0x4a   : > { %161 = sbr.rel (%p1417_p11) target bundleno = 1035 (0x40b), region = 28  ;;  %s1458_s30 = sand.u32 (!%p1417_p11), 1, %s1276_s10  }
  0x4b   : > { %s878_s4 = sshll.u32 (!%p1417_p11), %s1458_s30, 6  ;;  %s164_s19 = scalar_lea.sflag (!%p1417_p11), [#allocation3], %s1458_s30 }
  0x4c   : > { %s1462_s24 = scalar_lea.vmem (!%p1417_p11), [#allocation2], %s878_s4  ;;  %p1814_p6 = scmp.ne.s32.totalorder (!%p1417_p11), %s1809_s20, 0 }
  0x51   : > { %1259 = dma.done.wait (%p1814_p6), %s164_s19, 1024  }
  0x52   : > { %1261 = vsyncadd (%p1814_p6), %s164_s19, 4294966272  ;;  %s879_s23 = sshll.u32 %s1458_s30, 7  ;;  %s173_s3 = scalar_lea.sflag [#allocation6], %s1458_s30 }
  0x53   : > { %s1472_s5 = scalar_lea.vmem [#allocation5], %s879_s23 }
  0x54   : > { %1263 = dma.done.wait (%p1814_p6), %s173_s3, 2048  }
  0x55   : > { %1265 = vsyncadd (%p1814_p6), %s173_s3, 4294965248  ;;  %v1479_v0 = vld [vmem:[%s1472_s5] sm:$0xff]  ;;  %v1482_v1 = vld [vmem:[%s1472_s5 + $0x8] sm:$0xff]  ;;  %s1720_s20 = scalar_lea.vmem [#allocation7], %s879_s23  ;;  %s896_s8 = sshll.u32 %s1331_s13, 11 }
  0x56   : > { %v1485_v2 = vld [vmem:[%s1472_s5 + $0x10] sm:$0xff]  ;;  %v235_v3 = vpack.c.bf16 %v1482_v1, %v1479_v0  ;;  %v1490_v4 = vld [vmem:[%s1472_s5 + $0x18] sm:$0xff]  ;;  %v1495_v6 = vld [vmem:[%s1472_s5 + $0x20] sm:$0xff]  ;;  %s772_s17 = sshll.u32 %s1720_s20, 4  ;;  %s1754_s26 = scalar_lea.hbm %s1805_s2, %s896_s8  ;;  %s1756_s17 = int_to_ptr.vmem [resolvable:$true] %s772_s17 }
  0x57   : > { %v236_v5 = vpack.c.bf16 %v1490_v4, %v1485_v2  ;;  %v1498_v7 = vld [vmem:[%s1472_s5 + $0x28] sm:$0xff]  ;;  %v1501_v8 = vld [vmem:[%s1472_s5 + $0x30] sm:$0xff]  ;;  %v1506_v10 = vld [vmem:[%s1472_s5 + $0x38] sm:$0xff]  ;;  %s759_s13 = scalar_lea.sflag [#allocation4], %s1458_s30  ;;  %s1214_s27 = scalar_lea.vmem %s1756_s17, 2048 }
  0x58   : > { %945 = vmatprep.subr.bf16.mxu0 %v235_v3  ;;  %v237_v9 = vpack.c.bf16 %v1498_v7, %v1495_v6  ;;  %v1114_v11 = vld [vmem:[%s1462_s24] sm:$0xff]   ;;  %v238_v12 = vpack.c.bf16 %v1506_v10, %v1501_v8  ;;  %v1515_v14 = vld [vmem:[%s1472_s5 + $0x48] sm:$0xff]  ;;  %v1520_v16 = vld [vmem:[%s1472_s5 + $0x50] sm:$0xff]  ;;  %p1215_p13 = scmp.ne.s32.totalorder %s1756_s17, %s1214_s27  ;;  %p1815_p1 = scmp.ne.s32.totalorder %s1810_s21, 0 }
  0x59   : > { %946 = vmatpush3.bf16.msra.mxu0 %v235_v3  ;;  %961 = vmatprep.mubr.bf16.mxu0 %v1114_v11  ;;  %v1512_v13 = vld [vmem:[%s1472_s5 + $0x40] sm:$0xff]  ;;  %v1523_v17 = vld [vmem:[%s1472_s5 + $0x58] sm:$0xff]  ;;  %v1531_v20 = vld [vmem:[%s1472_s5 + $0x68] sm:$0xff]  ;;  %s1292_s29 = smov [#allocation7]  }
  0x5a   : > { %947 = vmatprep.subr.bf16.mxu0 %v236_v5  ;;  %993 = vmatprep.mubr.bf16.mxu1 %v1114_v11  ;;  %v239_v15 = vpack.c.bf16 %v1515_v14, %v1512_v13  ;;  %v240_v18 = vpack.c.bf16 %v1523_v17, %v1520_v16  ;;  %v1528_v19 = vld [vmem:[%s1472_s5 + $0x60] sm:$0xff]  ;;  %v1536_v22 = vld [vmem:[%s1472_s5 + $0x70] sm:$0xff]  ;;  %v1539_v23 = vld [vmem:[%s1472_s5 + $0x78] sm:$0xff]  ;;  %p1216_p11 = pnand %p1215_p13, %p1815_p1  ;;  %s1218_s6 = sshll.u32 %s1292_s29, 4  ;;  %s1219_s6 = int_to_ptr.vmem [resolvable:$false] %s1218_s6 }
  0x5b   : > { %v241_v21 = vpack.c.bf16 %v1531_v20, %v1528_v19  ;;  %v242_v24 = vpack.c.bf16 %v1539_v23, %v1536_v22  ;;  %v1544_v25 = vld [vmem:[%s1462_s24 + $0x8] sm:$0xff]   ;;  %v1547_v26 = vld [vmem:[%s1462_s24 + $0x10] sm:$0xff]   ;;  %v1552_v27 = vld [vmem:[%s1462_s24 + $0x18] sm:$0xff]   ;;  %s1220_s7 = scalar_lea.vmem %s1219_s6, 4096  ;;  %p1221_p5 = scmp.lt.s32.totalorder %s1756_s17, %s1219_s6 }
  0x5c   : > { %v1118_v28 = vld [vmem:[%s1462_s24 + $0x20] sm:$0xff]   ;;  %v1557_v29 = vld [vmem:[%s1462_s24 + $0x28] sm:$0xff]   ;;  %v1560_v30 = vld [vmem:[%s1462_s24 + $0x30] sm:$0xff]   ;;  %p1217_p10 = pneg %p1216_p11  ;;  %p1222_p7 = scmp.lt.s32.totalorder %s1220_s7, %s1214_s27 }
  0x5d   : > { %948 = vmatpush3.bf16.msra.mxu0 %v236_v5  ;;  %v1565_v31 = vld [vmem:[%s1462_s24 + $0x38] sm:$0xff]  }
  0x5e   : > { %949 = vmatprep.subr.bf16.mxu0 %v237_v9  ;;  %p1223_p9 = por %p1222_p7, %p1221_p5 }
  0x60   : > { %p1224_p3 = pnand %p1223_p9, %p1217_p10 }
  0x61   : > { %950 = vmatpush3.bf16.msra.mxu0 %v237_v9 }
  0x62   : > { %951 = vmatprep.subr.bf16.mxu0 %v238_v12 }
  0x65   : > { %952 = vmatpush3.bf16.msra.mxu0 %v238_v12 }
  0x66   : > { %953 = vmatprep.subr.bf16.mxu0 %v239_v15 }
  0x69   : > { %954 = vmatpush3.bf16.msra.mxu0 %v239_v15 }
  0x6a   : > { %955 = vmatprep.subr.bf16.mxu0 %v240_v18 }
  0x6d   : > { %956 = vmatpush3.bf16.msra.mxu0 %v240_v18 }
  0x6e   : > { %957 = vmatprep.subr.bf16.mxu0 %v241_v21 }
  0x71   : > { %958 = vmatpush3.bf16.msra.mxu0 %v241_v21 }
  0x72   : > { %959 = vmatprep.subr.bf16.mxu0 %v242_v24 }
  0x75   : > { %960 = vmatpush3.bf16.msra.mxu0 %v242_v24 }
  0x78   : > { %962 = vmatmul.mubr.bf16.vlgmr.msra.gmra.mrb[0].mxu0 %v1544_v25 }
  0x79   : > { %965 = vmatprep.mubr.bf16.mxu0 %v1547_v26 }
  0x80   : > { %966 = vmatmul.mubr.bf16.gmra.mrb[4].mxu0 %v1552_v27 }
  0x81   : > { %969 = vmatprep.mubr.bf16.mxu0 %v1118_v28 }
  0x88   : > { %970 = vmatmul.mubr.bf16.gmra.mrb[8].mxu0 %v1557_v29 }
  0x89   : > { %973 = vmatprep.mubr.bf16.mxu0 %v1560_v30 }
  0x90   : > { %974 = vmatmul.mubr.bf16.gmra.mrb[12].mxu0 %v1565_v31 }
  0x91   : > { %1025 = vmatprep.mubr.bf16.mxu0 %v1114_v11 }
 0x14b   : > { %v963_v32 = vpop.f32.mrb[0].mxu0 }
 0x14c   : > { %v325_v33 = vpop.f32.mrb[1].mxu0  ;;  %v390_v56 = vadd.f32 %v963_v32, %v1485_v2 }
 0x14d   : > { %v964_v34 = vpop.f32.mrb[2].mxu0  ;;  %v388_v57 = vadd.f32 %v325_v33, %v1479_v0 }
 0x14e   : > { %v405_v35 = vpack.c.bf16 %v964_v34, %v963_v32  ;;  %v328_v36 = vpop.f32.mrb[3].mxu0  ;;  %v391_v59 = vadd.f32 %v964_v34, %v1490_v4 }
 0x14f   : > { %v404_v37 = vpack.c.bf16 %v328_v36, %v325_v33  ;;  %v389_v62 = vadd.f32 %v328_v36, %v1482_v1 }
 0x151   : > { %977 = vmatprep.subr.bf16.mxu1 %v404_v37 }
 0x152   : > { %978 = vmatpush3.bf16.msra.mxu1 %v404_v37 }
 0x153   : > { %v967_v38 = vpop.f32.mrb[4].mxu0  ;;  %979 = vmatprep.subr.bf16.mxu1 %v405_v35 }
 0x154   : > { %v341_v39 = vpop.f32.mrb[5].mxu0  ;;  %v394_v0 = vadd.f32 %v967_v38, %v1501_v8 }
 0x155   : > { %v968_v40 = vpop.f32.mrb[6].mxu0  ;;  %v392_v4 = vadd.f32 %v341_v39, %v1495_v6 }
 0x156   : > { %v407_v41 = vpack.c.bf16 %v968_v40, %v967_v38  ;;  %v344_v42 = vpop.f32.mrb[7].mxu0  ;;  %980 = vmatpush3.bf16.msra.mxu1 %v405_v35  ;;  %v395_v1 = vadd.f32 %v968_v40, %v1506_v10 }
 0x157   : > { %v406_v43 = vpack.c.bf16 %v344_v42, %v341_v39  ;;  %v393_v24 = vadd.f32 %v344_v42, %v1498_v7 }
 0x159   : > { %981 = vmatprep.subr.bf16.mxu1 %v406_v43 }
 0x15a   : > { %982 = vmatpush3.bf16.msra.mxu1 %v406_v43 }
 0x15b   : > { %v1568_v44 = vpop.f32.mrb[8].mxu0  ;;  %983 = vmatprep.subr.bf16.mxu1 %v407_v41 }
 0x15c   : > { %v1570_v45 = vpop.f32.mrb[9].mxu0  ;;  %v398_v10 = vadd.f32 %v1568_v44, %v1520_v16 }
 0x15d   : > { %v1572_v46 = vpop.f32.mrb[10].mxu0  ;;  %v396_v7 = vadd.f32 %v1570_v45, %v1512_v13 }
 0x15e   : > { %v409_v47 = vpack.c.bf16 %v1572_v46, %v1568_v44  ;;  %v1576_v48 = vpop.f32.mrb[11].mxu0  ;;  %984 = vmatpush3.bf16.msra.mxu1 %v407_v41  ;;  %v399_v37 = vadd.f32 %v1572_v46, %v1523_v17 }
 0x15f   : > { %v408_v49 = vpack.c.bf16 %v1576_v48, %v1570_v45  ;;  %v397_v40 = vadd.f32 %v1576_v48, %v1515_v14 }
 0x161   : > { %985 = vmatprep.subr.bf16.mxu1 %v408_v49 }
 0x162   : > { %986 = vmatpush3.bf16.msra.mxu1 %v408_v49 }
 0x163   : > { %v1580_v50 = vpop.f32.mrb[12].mxu0  ;;  %987 = vmatprep.subr.bf16.mxu1 %v409_v47 }
 0x164   : > { %v1582_v51 = vpop.f32.mrb[13].mxu0  ;;  %v402_v45 = vadd.f32 %v1580_v50, %v1536_v22 }
 0x165   : > { %v1584_v52 = vpop.f32.mrb[14].mxu0  ;;  %v400_v17 = vadd.f32 %v1582_v51, %v1528_v19 }
 0x166   : > { %v411_v53 = vpack.c.bf16 %v1584_v52, %v1580_v50  ;;  %v1588_v54 = vpop.f32.mrb[15].mxu0  ;;  %988 = vmatpush3.bf16.msra.mxu1 %v409_v47  ;;  %v403_v46 = vadd.f32 %v1584_v52, %v1539_v23 }
 0x167   : > { %v410_v55 = vpack.c.bf16 %v1588_v54, %v1582_v51 }
 0x169   : > { %989 = vmatprep.subr.bf16.mxu1 %v410_v55 }
 0x16a   : > { %990 = vmatpush3.bf16.msra.mxu1 %v410_v55 }
 0x16b   : > { %991 = vmatprep.subr.bf16.mxu1 %v411_v53 }
 0x16e   : > { %992 = vmatpush3.bf16.msra.mxu1 %v411_v53  ;;  %v401_v53 = vadd.f32 %v1588_v54, %v1531_v20 }
 0x171   : > { %994 = vmatmul.mubr.bf16.vlgmr.msra.gmra.mrb[0].mxu1 %v1544_v25 }
 0x172   : > { %997 = vmatprep.mubr.bf16.mxu1 %v1547_v26 }
 0x179   : > { %998 = vmatmul.mubr.bf16.gmra.mrb[4].mxu1 %v1552_v27 }
 0x17a   : > { %1001 = vmatprep.mubr.bf16.mxu1 %v1118_v28 }
 0x181   : > { %1002 = vmatmul.mubr.bf16.gmra.mrb[8].mxu1 %v1557_v29 }
 0x182   : > { %1005 = vmatprep.mubr.bf16.mxu1 %v1560_v30 }
 0x189   : > { %1006 = vmatmul.mubr.bf16.gmra.mrb[12].mxu1 %v1565_v31 }
 0x18a   : > { %1033 = vmatprep.mubr.bf16.mxu1 %v1118_v28 }
 0x244   : > { %v995_v58 = vpop.f32.mrb[0].mxu1 }
 0x245   : > { %v1601_v60 = vadd.f32 %v995_v58, %v390_v56  ;;  %v446_v61 = vpop.f32.mrb[1].mxu1 }
 0x246   : > { %v1604_v63 = vadd.f32 %v446_v61, %v388_v57  ;;  %v996_v3 = vpop.f32.mrb[2].mxu1 }
 0x247   : > { %v1606_v5 = vadd.f32 %v996_v3, %v391_v59  ;;  %v526_v9 = vpack.c.bf16 %v996_v3, %v995_v58  ;;  %v449_v11 = vpop.f32.mrb[3].mxu1 }
 0x248   : > { %v1608_v12 = vadd.f32 %v449_v11, %v389_v62  ;;  %v525_v2 = vpack.c.bf16 %v449_v11, %v446_v61 }
 0x24a   : > { %1009 = vmatprep.subr.bf16.mxu0 %v525_v2  ;;  %1041 = vmatprep.subr.bf16.mxu1 %v525_v2 }
 0x24b   : > { %1010 = vmatpush3.bf16.msra.mxu0 %v525_v2  ;;  %1049 = vmatpush3.bf16.msra.mxu1 %v525_v2 }
 0x24c   : > { %v999_v15 = vpop.f32.mrb[4].mxu1  ;;  %1011 = vmatprep.subr.bf16.mxu0 %v526_v9  ;;  %1042 = vmatprep.subr.bf16.mxu1 %v526_v9 }
 0x24d   : > { %v1613_v18 = vadd.f32 %v999_v15, %v394_v0  ;;  %v462_v21 = vpop.f32.mrb[5].mxu1 }
 0x24e   : > { %v1616_v28 = vadd.f32 %v462_v21, %v392_v4  ;;  %v1000_v32 = vpop.f32.mrb[6].mxu1 }
 0x24f   : > { %v1618_v33 = vadd.f32 %v1000_v32, %v395_v1  ;;  %v528_v8 = vpack.c.bf16 %v1000_v32, %v999_v15  ;;  %v465_v34 = vpop.f32.mrb[7].mxu1  ;;  %1012 = vmatpush3.bf16.msra.mxu0 %v526_v9  ;;  %1050 = vmatpush3.bf16.msra.mxu1 %v526_v9 }
 0x250   : > { %v1620_v6 = vadd.f32 %v465_v34, %v393_v24  ;;  %v527_v35 = vpack.c.bf16 %v465_v34, %v462_v21 }
 0x252   : > { %1013 = vmatprep.subr.bf16.mxu0 %v527_v35  ;;  %1043 = vmatprep.subr.bf16.mxu1 %v527_v35 }
 0x253   : > { %1014 = vmatpush3.bf16.msra.mxu0 %v527_v35  ;;  %1051 = vmatpush3.bf16.msra.mxu1 %v527_v35 }
 0x254   : > { %v1003_v36 = vpop.f32.mrb[8].mxu1  ;;  %1015 = vmatprep.subr.bf16.mxu0 %v528_v8  ;;  %1044 = vmatprep.subr.bf16.mxu1 %v528_v8 }
 0x255   : > { %v519_v38 = vadd.f32 %v1003_v36, %v398_v10  ;;  %v478_v39 = vpop.f32.mrb[9].mxu1 }
 0x256   : > { %v517_v41 = vadd.f32 %v478_v39, %v396_v7  ;;  %v1004_v42 = vpop.f32.mrb[10].mxu1 }
 0x257   : > { %v520_v43 = vadd.f32 %v1004_v42, %v399_v37  ;;  %v530_v16 = vpack.c.bf16 %v1004_v42, %v1003_v36  ;;  %v481_v44 = vpop.f32.mrb[11].mxu1  ;;  %1016 = vmatpush3.bf16.msra.mxu0 %v528_v8  ;;  %1052 = vmatpush3.bf16.msra.mxu1 %v528_v8 }
 0x258   : > { %v518_v47 = vadd.f32 %v481_v44, %v397_v40  ;;  %v529_v13 = vpack.c.bf16 %v481_v44, %v478_v39 }
 0x25a   : > { %1017 = vmatprep.subr.bf16.mxu0 %v529_v13  ;;  %1045 = vmatprep.subr.bf16.mxu1 %v529_v13 }
 0x25b   : > { %1018 = vmatpush3.bf16.msra.mxu0 %v529_v13  ;;  %1053 = vmatpush3.bf16.msra.mxu1 %v529_v13 }
 0x25c   : > { %v1007_v14 = vpop.f32.mrb[12].mxu1  ;;  %1019 = vmatprep.subr.bf16.mxu0 %v530_v16  ;;  %1046 = vmatprep.subr.bf16.mxu1 %v530_v16 }
 0x25d   : > { %v523_v48 = vadd.f32 %v1007_v14, %v402_v45  ;;  %v494_v49 = vpop.f32.mrb[13].mxu1 }
 0x25e   : > { %v521_v55 = vadd.f32 %v494_v49, %v400_v17  ;;  %v1008_v56 = vpop.f32.mrb[14].mxu1 }
 0x25f   : > { %v524_v57 = vadd.f32 %v1008_v56, %v403_v46  ;;  %v532_v22 = vpack.c.bf16 %v1008_v56, %v1007_v14  ;;  %v497_v50 = vpop.f32.mrb[15].mxu1  ;;  %1020 = vmatpush3.bf16.msra.mxu0 %v530_v16  ;;  %1054 = vmatpush3.bf16.msra.mxu1 %v530_v16 }
 0x260   : > { %v522_v58 = vadd.f32 %v497_v50, %v401_v53  ;;  %v531_v19 = vpack.c.bf16 %v497_v50, %v494_v49 }
 0x262   : > { %1021 = vmatprep.subr.bf16.mxu0 %v531_v19  ;;  %1047 = vmatprep.subr.bf16.mxu1 %v531_v19 }
 0x263   : > { %1022 = vmatpush3.bf16.msra.mxu0 %v531_v19  ;;  %1055 = vmatpush3.bf16.msra.mxu1 %v531_v19 }
 0x264   : > { %1023 = vmatprep.subr.bf16.mxu0 %v532_v22  ;;  %1048 = vmatprep.subr.bf16.mxu1 %v532_v22 }
 0x267   : > { %1024 = vmatpush3.bf16.msra.mxu0 %v532_v22  ;;  %1056 = vmatpush3.bf16.msra.mxu1 %v532_v22 }
 0x26a   : > { %1026 = vmatmul.mubr.bf16.vlgmr.msra.gmra.mrb[16].mxu0 %v1544_v25  ;;  %1034 = vmatmul.mubr.bf16.vlgmr.msra.gmra.mrb[16].mxu1 %v1557_v29 }
 0x26b   : > { %1029 = vmatprep.mubr.bf16.mxu0 %v1547_v26  ;;  %1037 = vmatprep.mubr.bf16.mxu1 %v1560_v30 }
 0x272   : > { %1030 = vmatmul.mubr.bf16.gmra.mrb[20].mxu0 %v1552_v27  ;;  %1038 = vmatmul.mubr.bf16.gmra.mrb[20].mxu1 %v1565_v31 }
 0x33d   : > { %v1027_v20 = vpop.f32.mrb[16].mxu0  ;;  %v1035_v23 = vpop.f32.mrb[16].mxu1 }
 0x33e   : > { %v1645_v51 = vadd.f32 %v1027_v20, %v1601_v60  ;;  %v1647_v52 = vadd.f32 %v1035_v23, %v519_v38  ;;  %v567_v54 = vpop.f32.mrb[17].mxu0  ;;  %v599_v59 = vpop.f32.mrb[17].mxu1 }
 0x33f   : > { %v1650_v25 = vadd.f32 %v567_v54, %v1604_v63  ;;  %v1652_v29 = vadd.f32 %v599_v59, %v517_v41  ;;  %v1028_v26 = vpop.f32.mrb[18].mxu0  ;;  %v1036_v30 = vpop.f32.mrb[18].mxu1 }
 0x340   : > { %v1655_v27 = vadd.f32 %v1028_v26, %v1606_v5  ;;  %v1657_v31 = vadd.f32 %v1036_v30, %v520_v43  ;;  %v570_v61 = vpop.f32.mrb[19].mxu0  ;;  %v602_v62 = vpop.f32.mrb[19].mxu1  ;;  %v656_v60 = vmul.f32 %v1647_v52, %v1647_v52  ;;  %v648_v3 = vmul.f32 %v1645_v51, %v1645_v51 }
 0x341   : > { %v1664_v63 = vadd.f32 %v570_v61, %v1608_v12  ;;  %v1666_v9 = vadd.f32 %v602_v62, %v518_v47  ;;  %v646_v5 = vmul.f32 %v1650_v25, %v1650_v25  ;;  %v654_v7 = vmul.f32 %v1652_v29, %v1652_v29 }
 0x342   : > { %682 = vadd.xlane.f32.xlu0 %v656_v60  ;;  %666 = vadd.xlane.f32.xlu1 %v648_v3  ;;  %v649_v11 = vmul.f32 %v1655_v27, %v1655_v27  ;;  %v657_v36 = vmul.f32 %v1657_v31, %v1657_v31 }
 0x343   : > { %v647_v38 = vmul.f32 %v1664_v63, %v1664_v63 }
 0x345   : > { %v1031_v2 = vpop.f32.mrb[20].mxu0  ;;  %v1039_v0 = vpop.f32.mrb[20].mxu1 }
 0x346   : > { %v1673_v4 = vadd.f32 %v1031_v2, %v1613_v18  ;;  %v1675_v15 = vadd.f32 %v1039_v0, %v523_v48  ;;  %v615_v1 = vpop.f32.mrb[21].mxu1  ;;  %662 = vadd.xlane.f32.xlu0 %v646_v5  ;;  %668 = vadd.xlane.f32.xlu1 %v649_v11  ;;  %v583_v12 = vpop.f32.mrb[21].mxu0 }
 0x347   : > { %v1677_v21 = vadd.f32 %v615_v1, %v521_v55  ;;  %v1680_v24 = vadd.f32 %v583_v12, %v1616_v28  ;;  %v1032_v32 = vpop.f32.mrb[22].mxu0  ;;  %v1040_v8 = vpop.f32.mrb[22].mxu1 }
 0x348   : > { %v1683_v34 = vadd.f32 %v1032_v32, %v1618_v33  ;;  %v1685_v35 = vadd.f32 %v1040_v8, %v524_v57  ;;  %v586_v18 = vpop.f32.mrb[23].mxu0  ;;  %v618_v10 = vpop.f32.mrb[23].mxu1  ;;  %v655_v33 = vmul.f32 %v1666_v9, %v1666_v9  ;;  %v652_v39 = vmul.f32 %v1673_v4, %v1673_v4 }
 0x349   : > { %v1692_v37 = vadd.f32 %v586_v18, %v1620_v6  ;;  %v1694_v28 = vadd.f32 %v618_v10, %v522_v58  ;;  %v650_v6 = vmul.f32 %v1680_v24, %v1680_v24  ;;  %v658_v42 = vmul.f32 %v1677_v21, %v1677_v21 }
 0x34a   : > { %678 = vadd.xlane.f32.xlu0 %v654_v7  ;;  %684 = vadd.xlane.f32.xlu1 %v657_v36  ;;  %v653_v40 = vmul.f32 %v1683_v34, %v1683_v34  ;;  %v660_v16 = vmul.f32 %v1675_v15, %v1675_v15  ;;  %v661_v44 = vmul.f32 %v1685_v35, %v1685_v35 }
 0x34b   : > { %v651_v41 = vmul.f32 %v1692_v37, %v1692_v37  ;;  %v659_v43 = vmul.f32 %v1694_v28, %v1694_v28 }
 0x34e   : > { %680 = vadd.xlane.f32.xlu1 %v655_v33  ;;  %664 = vadd.xlane.f32.xlu0 %v647_v38 }
 0x352   : > { %674 = vadd.xlane.f32.xlu0 %v652_v39  ;;  %676 = vadd.xlane.f32.xlu1 %v653_v40 }
 0x356   : > { %670 = vadd.xlane.f32.xlu0 %v650_v6  ;;  %672 = vadd.xlane.f32.xlu1 %v651_v41 }
 0x35a   : > { %686 = vadd.xlane.f32.xlu0 %v658_v42  ;;  %688 = vadd.xlane.f32.xlu1 %v659_v43 }
 0x35e   : > { %690 = vadd.xlane.f32.xlu0 %v660_v16  ;;  %692 = vadd.xlane.f32.xlu1 %v661_v44 }
 0x3cf   : > { %v683_v47 = vpop.xlane.xlu0 %682  ;;  %v667_v13 = vpop.xlane.xlu1 %666 }
 0x3d0   : > { %v704_v45 = vmax.f32 %v683_v47, 1e-24  ;;  %v696_v17 = vmax.f32 %v667_v13, 1e-24 }
 0x3d2   : > { %1122 = vrsqrt.f32 %v704_v45 }
 0x3d3   : > { %1124 = vrsqrt.f32 %v696_v17  ;;  %v663_v14 = vpop.xlane.xlu0 %662  ;;  %v669_v46 = vpop.xlane.xlu1 %668 }
 0x3d4   : > { %v694_v48 = vmax.f32 %v663_v14, 1e-24  ;;  %v697_v49 = vmax.f32 %v669_v46, 1e-24 }
 0x3d6   : > { %1126 = vrsqrt.f32 %v694_v48 }
 0x3d7   : > { %1128 = vrsqrt.f32 %v697_v49  ;;  %v679_v53 = vpop.xlane.xlu0 %678  ;;  %v685_v55 = vpop.xlane.xlu1 %684 }
 0x3d8   : > { %v702_v56 = vmax.f32 %v679_v53, 1e-24  ;;  %v705_v57 = vmax.f32 %v685_v55, 1e-24 }
 0x3da   : > { %1130 = vrsqrt.f32 %v702_v56 }
 0x3db   : > { %1132 = vrsqrt.f32 %v705_v57  ;;  %v681_v22 = vpop.xlane.xlu1 %680  ;;  %v665_v50 = vpop.xlane.xlu0 %664 }
 0x3dc   : > { %v1123_v58 = vpop.eup %1122  ;;  %v703_v19 = vmax.f32 %v681_v22, 1e-24  ;;  %v695_v20 = vmax.f32 %v665_v50, 1e-24 }
 0x3dd   : > { %v1125_v23 = vpop.eup %1124  ;;  %v736_v54 = vmul.f32 %v1123_v58, %v1647_v52 }
 0x3de   : > { %v728_v59 = vmul.f32 %v1125_v23, %v1645_v51  ;;  %1134 = vrsqrt.f32 %v703_v19 }
 0x3df   : > { %752 = vst [vmem:[%s1720_s20 + $0x50] sm:$0xff] %v736_v54  ;;  %1136 = vrsqrt.f32 %v695_v20  ;;  %v675_v26 = vpop.xlane.xlu0 %674  ;;  %v677_v30 = vpop.xlane.xlu1 %676 }
 0x3e0   : > { %v1127_v61 = vpop.eup %1126  ;;  %744 = vst [vmem:[%s1720_s20 + $0x10] sm:$0xff] %v728_v59  ;;  %v700_v62 = vmax.f32 %v675_v26, 1e-24  ;;  %v701_v60 = vmax.f32 %v677_v30, 1e-24 }
 0x3e1   : > { %v1129_v3 = vpop.eup %1128  ;;  %v726_v51 = vmul.f32 %v1127_v61, %v1650_v25 }
 0x3e2   : > { %v729_v52 = vmul.f32 %v1129_v3, %v1655_v27  ;;  %1138 = vrsqrt.f32 %v700_v62 }
 0x3e3   : > { %742 = vst [vmem:[%s1720_s20] sm:$0xff] %v726_v51  ;;  %1140 = vrsqrt.f32 %v701_v60  ;;  %v671_v5 = vpop.xlane.xlu0 %670  ;;  %v673_v11 = vpop.xlane.xlu1 %672 }
 0x3e4   : > { %v1131_v2 = vpop.eup %1130  ;;  %745 = vst [vmem:[%s1720_s20 + $0x18] sm:$0xff] %v729_v52  ;;  %v698_v0 = vmax.f32 %v671_v5, 1e-24  ;;  %v699_v1 = vmax.f32 %v673_v11, 1e-24 }
 0x3e5   : > { %v1133_v12 = vpop.eup %1132  ;;  %v734_v32 = vmul.f32 %v1131_v2, %v1652_v29 }
 0x3e6   : > { %v737_v8 = vmul.f32 %v1133_v12, %v1657_v31  ;;  %1142 = vrsqrt.f32 %v698_v0 }
 0x3e7   : > { %750 = vst [vmem:[%s1720_s20 + $0x40] sm:$0xff] %v734_v32  ;;  %1144 = vrsqrt.f32 %v699_v1  ;;  %v687_v25 = vpop.xlane.xlu0 %686  ;;  %v689_v27 = vpop.xlane.xlu1 %688 }
 0x3e8   : > { %v1135_v18 = vpop.eup %1134  ;;  %753 = vst [vmem:[%s1720_s20 + $0x58] sm:$0xff] %v737_v8  ;;  %v706_v10 = vmax.f32 %v687_v25, 1e-24  ;;  %v707_v7 = vmax.f32 %v689_v27, 1e-24 }
 0x3e9   : > { %v1137_v36 = vpop.eup %1136  ;;  %v735_v33 = vmul.f32 %v1135_v18, %v1666_v9 }
 0x3ea   : > { %v727_v38 = vmul.f32 %v1137_v36, %v1664_v63  ;;  %1146 = vrsqrt.f32 %v706_v10 }
 0x3eb   : > { %751 = vst [vmem:[%s1720_s20 + $0x48] sm:$0xff] %v735_v33  ;;  %1148 = vrsqrt.f32 %v707_v7  ;;  %v691_v29 = vpop.xlane.xlu0 %690  ;;  %v693_v31 = vpop.xlane.xlu1 %692 }
 0x3ec   : > { %v1139_v39 = vpop.eup %1138  ;;  %743 = vst [vmem:[%s1720_s20 + $0x8] sm:$0xff] %v727_v38  ;;  %v708_v40 = vmax.f32 %v691_v29, 1e-24  ;;  %v709_v6 = vmax.f32 %v693_v31, 1e-24 }
 0x3ed   : > { %v1141_v41 = vpop.eup %1140  ;;  %v732_v42 = vmul.f32 %v1139_v39, %v1673_v4 }
 0x3ee   : > { %v733_v9 = vmul.f32 %v1141_v41, %v1683_v34  ;;  %1150 = vrsqrt.f32 %v708_v40 }
 0x3ef   : > { %748 = vst [vmem:[%s1720_s20 + $0x30] sm:$0xff] %v732_v42  ;;  %1152 = vrsqrt.f32 %v709_v6 }
 0x3f0   : > { %v1143_v63 = vpop.eup %1142  ;;  %749 = vst [vmem:[%s1720_s20 + $0x38] sm:$0xff] %v733_v9 }
 0x3f1   : > { %v1145_v43 = vpop.eup %1144  ;;  %v730_v16 = vmul.f32 %v1143_v63, %v1680_v24 }
 0x3f2   : > { %v731_v44 = vmul.f32 %v1145_v43, %v1692_v37 }
 0x3f3   : > { %746 = vst [vmem:[%s1720_s20 + $0x20] sm:$0xff] %v730_v16 }
 0x3f4   : > { %v1147_v47 = vpop.eup %1146  ;;  %747 = vst [vmem:[%s1720_s20 + $0x28] sm:$0xff] %v731_v44 }
 0x3f5   : > { %v1149_v4 = vpop.eup %1148  ;;  %v738_v34 = vmul.f32 %v1147_v47, %v1677_v21 }
 0x3f6   : > { %v739_v13 = vmul.f32 %v1149_v4, %v1694_v28 }
 0x3f7   : > { %754 = vst [vmem:[%s1720_s20 + $0x60] sm:$0xff] %v738_v34 }
 0x3f8   : > { %v1151_v45 = vpop.eup %1150  ;;  %755 = vst [vmem:[%s1720_s20 + $0x68] sm:$0xff] %v739_v13 }
 0x3f9   : > { %v1153_v24 = vpop.eup %1152  ;;  %v740_v37 = vmul.f32 %v1151_v45, %v1675_v15 }
 0x3fa   : > { %v741_v21 = vmul.f32 %v1153_v24, %v1685_v35 }
 0x3fb   : > { %756 = vst [vmem:[%s1720_s20 + $0x70] sm:$0xff] %v740_v37 }
 0x3fc   : > { %757 = vst [vmem:[%s1720_s20 + $0x78] sm:$0xff] %v741_v21 }
 0x3fd   : > { %1227 = shalt.err (!%p1224_p3)
}
 0x3fe   : > { %s1228_s14 = scalar_lea.hbm %s1754_s26, 2048  ;;  %s1232_s19 = scalar_lea.hbm %s1805_s2, 4096 }
 0x3ff   : > { %p1229_p12 = scmp.ne.s32.totalorder %s1754_s26, %s1228_s14  ;;  %p1233_p2 = scmp.lt.u32.totalorder %s1754_s26, %s1805_s2 }
 0x400   : > { %p1234_p4 = scmp.lt.u32.totalorder %s1232_s19, %s1228_s14  ;;  %p1236_p13 = scmp.lt.u32.totalorder %s1228_s14, %s1754_s26 }
 0x401   : > { %p1230_p8 = pnand %p1229_p12, %p1815_p1 }
 0x402   : > { %p1235_p6 = por %p1234_p4, %p1233_p2 }
 0x403   : > { %p1231_p0 = pneg %p1230_p8 }
 0x404   : > { %p1237_p11 = por %p1236_p13, %p1235_p6 }
 0x406   : > { %p1238_p10 = pnand %p1237_p11, %p1231_p0 }
 0x408   : > { %1241 = shalt.err (!%p1238_p10)
}
 0x409   : > { %s1293_s3 = smov 128   ;;  %s1294_s5 = smov 8  }
 0x40a   : > { %1061 = dma.vmem_to_hbm [thread:$0]  (%p1815_p1), %s1756_s17, 2048, %s1754_s26, %s759_s13, %s1293_s3, %s1293_s3, %s1294_s5  }
 0x40b PF: > { %s787_s20 = sand.u32 1, %s1272_s9   ;;  %p1816_p5 = scmp.ne.s32.totalorder %s1811_s22, 0 }
 0x40c   : > { %p1817_p7 = scmp.ge.s32.totalorder %s1284_s12, 2  ;;  %s788_s8 = scalar_lea.sflag [#allocation4], %s787_s20 }
 0x40e   : > { %p1071_p9 = pnand %p1817_p7, %p1816_p5 }
 0x410   : > { %1267 = dma.done.wait (!%p1071_p9), %s788_s8, 2048  }
 0x411   : > { %1269 = vsyncadd (!%p1071_p9), %s788_s8, 4294965248  ;;  %p18_p3 = scmp.ge.s32.totalorder %s1335_s15, 4   ;;  %s1818_s9 = smov %s1276_s10 }
 0x412   : > { %s1819_s10 = smov %s1280_s11  ;;  %s1820_s11 = smov %s1347_s18 }
 0x413   : > { %s1821_s12 = smov %s1335_s15  ;;  %20 = sbr.rel (!%p18_p3) target bundleno = 7 (0x7), region = 86 }
 0x41a   :  { %793 = vsyncpa [#allocation3], 1 }
 0x41b   :  { %795 = vsyncpa [#allocation3 + $0x1], 1 }
 0x41c   :  { %796 = vsyncpa [#allocation6], 1 }
 0x41d   :  { %798 = vsyncpa [#allocation6 + $0x1], 1 }
 0x41e   :  { %799 = vsyncpa [#allocation4], 1 }
 0x41f   :  { %801 = vsyncpa [#allocation4 + $0x1], 1 }

</bundles_post_ra>
